<compile_context>
chip_gen: v5e
topology: v5e:2x2
jax: 0.10.0
libtpu: 0.0.40
codegen_flags: <defaults>
</compile_context>

<pallas_src>
import numpy as np
import jax
import jax.numpy as jnp
from jax import lax
from jax.experimental import pallas as pl
from jax.experimental.pallas import tpu as pltpu


def _round_up(n, m):
    return ((n + m - 1) // m) * m


# ----------------------------------------------------------------------------
# Fused Pallas kernel: conv1 -> conv2 -> pool -> conv3 -> pool -> fc
# ----------------------------------------------------------------------------
def conv_stack_kernel(x_ref, w1_ref, s1_ref, b1_ref,
                      w2_ref, s2_ref, b2_ref,
                      w3_ref, s3_ref, b3_ref,
                      fcw_ref, fcb_ref,
                      out_ref,
                      xbuf, h1buf, p2buf):
    """One (batch, time-tile) step of the whole ConvStack.

    x_ref   : (1, TT, F)   input tile (frequency on lanes)
    w*_ref  : (3, K, N)    banded conv weights, one matrix per causal time tap
    s*/b*   : (1, N)       folded BN scale / shift (conv bias included)
    fcw/fcb : (Din, O) / (1, O)
    out_ref : (1, TT, O)
    xbuf/h1buf/p2buf : VMEM carry buffers (TT+8, width); rows [6:8) hold the
        2-row causal halo carried from the previous time tile, rows [8:8+TT)
        hold the current tile.
    """
    it = pl.program_id(1)
    TT = out_ref.shape[1]
    wdt = w1_ref.dtype                      # matmul operand dtype (f32 or bf16)

    @pl.when(it == 0)
    def _reset_causal_carry():              # == ZeroPad2d((1,1,2,0)) time pad
        xbuf[pl.ds(0, 8), :] = jnp.zeros((8, xbuf.shape[1]), xbuf.dtype)
        h1buf[pl.ds(0, 8), :] = jnp.zeros((8, h1buf.shape[1]), h1buf.dtype)
        p2buf[pl.ds(0, 8), :] = jnp.zeros((8, p2buf.shape[1]), p2buf.dtype)

    # current tile goes after the carry rows (sublane-aligned offset 8)
    xbuf[pl.ds(8, TT), :] = x_ref[0].astype(xbuf.dtype)

    def conv_bn_relu(buf, w_ref, s_ref, b_ref):
        n_out = w_ref.shape[2]
        bufv = buf[...]                     # (TT+8, width)
        acc = jnp.zeros((TT, n_out), jnp.float32)
        for dt in range(3):                 # causal 3-tap time conv -> 3 matmuls
            a = bufv[6 + dt:6 + dt + TT, :].astype(wdt)
            acc = acc + jnp.dot(a, w_ref[dt], preferred_element_type=jnp.float32)
        return jnp.maximum(acc * s_ref[...] + b_ref[...], 0.0)

    # conv1 + BN + ReLU
    h1 = conv_bn_relu(xbuf, w1_ref, s1_ref, b1_ref)                   # (TT, F*C1)
    h1buf[pl.ds(8, TT), :] = h1.astype(h1buf.dtype)

    # conv2 + BN + ReLU + MaxPool(1,2) over freq (even/odd columns pre-split)
    h2 = conv_bn_relu(h1buf, w2_ref, s2_ref, b2_ref)                  # (TT, F*C1)
    half2 = h2.shape[1] // 2
    p2 = jnp.maximum(h2[:, :half2], h2[:, half2:])                    # (TT, F/2*C1)
    p2buf[pl.ds(8, TT), :] = p2.astype(p2buf.dtype)

    # conv3 + BN + ReLU + MaxPool(1,2) over freq
    h3 = conv_bn_relu(p2buf, w3_ref, s3_ref, b3_ref)                  # (TT, F/2*C2)
    half3 = h3.shape[1] // 2
    p3 = jnp.maximum(h3[:, :half3], h3[:, half3:])                    # (TT, F/4*C2)

    # fc (Dropout layers are identity at inference)
    y = jnp.dot(p3.astype(fcw_ref.dtype), fcw_ref[...],
                preferred_element_type=jnp.float32) + fcb_ref[...]
    out_ref[0] = y.astype(out_ref.dtype)

    # carry the last 2 rows of this tile as the next tile's causal halo
    xbuf[pl.ds(6, 2), :] = xbuf[pl.ds(TT + 6, 2), :]
    h1buf[pl.ds(6, 2), :] = h1buf[pl.ds(TT + 6, 2), :]
    p2buf[pl.ds(6, 2), :] = p2buf[pl.ds(TT + 6, 2), :]


# ----------------------------------------------------------------------------
# Wrapper: grid / BlockSpecs / scratch
# ----------------------------------------------------------------------------
def conv_stack_forward(mel, p, input_features, output_features, *, time_tile=512):
    B, T, F = mel.shape
    assert F == input_features and F % 4 == 0 and output_features % 16 == 0
    O = output_features
    C1, C2 = O // 16, O // 8
    N1 = F * C1                      # conv1/conv2 output width
    Np2 = (F // 2) * C1              # pooled conv2 width
    N3 = (F // 2) * C2               # conv3 output width
    Din = (F // 4) * C2              # fc input width

    TT = _round_up(min(time_tile, _round_up(T, 8)), 8)
    Tpad = _round_up(T, TT)
    nT = Tpad // TT
    x = mel if Tpad == T else jnp.pad(mel, ((0, 0), (0, Tpad - T), (0, 0)))

    def _rep3(shape):
        return pl.BlockSpec(shape, lambda b, t: (0, 0, 0))

    def _rep2(shape):
        return pl.BlockSpec(shape, lambda b, t: (0, 0))

    in_specs = [
        pl.BlockSpec((1, TT, F), lambda b, t: (b, t, 0)),
        _rep3(p["w1"].shape), _rep2(p["s1"].shape), _rep2(p["b1"].shape),
        _rep3(p["w2"].shape), _rep2(p["s2"].shape), _rep2(p["b2"].shape),
        _rep3(p["w3"].shape), _rep2(p["s3"].shape), _rep2(p["b3"].shape),
        _rep2(p["fc_w"].shape), _rep2(p["fc_b"].shape),
    ]

    flops = 2 * B * Tpad * (3 * F * N1 + 3 * N1 * N1 + 3 * Np2 * N3 + Din * O)
    weight_bytes = sum(int(np.prod(p[k].shape)) * p[k].dtype.itemsize
                       for k in ("w1", "s1", "b1", "w2", "s2", "b2",
                                 "w3", "s3", "b3", "fc_w", "fc_b"))
    bytes_accessed = int(x.size) * x.dtype.itemsize + B * Tpad * O * 4 + weight_bytes

    out = pl.pallas_call(
        conv_stack_kernel,
        out_shape=jax.ShapeDtypeStruct((B, Tpad, O), jnp.float32),
        grid=(B, nT),
        in_specs=in_specs,
        out_specs=pl.BlockSpec((1, TT, O), lambda b, t: (b, t, 0)),
        scratch_shapes=[
            pltpu.VMEM((TT + 8, F), jnp.float32),
            pltpu.VMEM((TT + 8, N1), jnp.float32),
            pltpu.VMEM((TT + 8, Np2), jnp.float32),
        ],
        compiler_params=pltpu.CompilerParams(
            dimension_semantics=("parallel", "arbitrary")),
        cost_estimate=pl.CostEstimate(flops=flops, transcendentals=0,
                                      bytes_accessed=bytes_accessed),
    )(x, p["w1"], p["s1"], p["b1"], p["w2"], p["s2"], p["b2"],
      p["w3"], p["s3"], p["b3"], p["fc_w"], p["fc_b"])
    return out if Tpad == T else out[:, :T, :]


# ----------------------------------------------------------------------------
# Parameter setup (torch layouts -> kernel layouts)
# ----------------------------------------------------------------------------
def make_band_weights(w, F):
    """torch (Cout, Cin, 3, 3) conv weight -> (3, F*Cin, F*Cout) banded matrices.

    Frequency zero-padding (1 bin each side) is folded in by dropping
    out-of-range taps, so the kernel never pads activations.
    """
    w = np.asarray(w)
    Cout, Cin, _, _ = w.shape
    band = np.zeros((3, F * Cin, F * Cout), np.float32)
    for dt in range(3):
        for df in range(3):
            wt = w[:, :, dt, df].T                        # (Cin, Cout)
            for fo in range(F):
                fi = fo + df - 1
                if 0 <= fi < F:
                    band[dt, fi * Cin:(fi + 1) * Cin, fo * Cout:(fo + 1) * Cout] = wt
    return band


def parity_cols(F, C):
    """Column order putting even output frequencies first, then odd ones."""
    ev = np.arange(0, F, 2)[:, None] * C + np.arange(C)[None, :]
    od = np.arange(1, F, 2)[:, None] * C + np.arange(C)[None, :]
    return np.concatenate([ev.reshape(-1), od.reshape(-1)])


def init_params(key, input_features, output_features):
    F, O = input_features, output_features
    C1, C2 = O // 16, O // 8
    keys = jax.random.split(key, 20)

    def nrm(k, shape, s=0.1):
        return s * jax.random.normal(k, shape, jnp.float32)

    p, raw = {}, {}
    specs = [("1", 1, C1, F, False), ("2", C1, C1, F, True), ("3", C1, C2, F // 2, True)]
    i = 0
    for name, cin, cout, freq, pool_after in specs:
        w = nrm(keys[i], (cout, cin, 3, 3)); i += 1
        b = nrm(keys[i], (cout,)); i += 1
        gamma = 1.0 + nrm(keys[i], (cout,)); i += 1
        beta = nrm(keys[i], (cout,)); i += 1
        mean = nrm(keys[i], (cout,)); i += 1
        var = 1.0 + jnp.abs(nrm(keys[i], (cout,))); i += 1
        scale = gamma / jnp.sqrt(var + 1e-5)              # fold BN (eval) + conv bias
        shift = (b - mean) * scale + beta
        band = make_band_weights(w, freq)                 # (3, freq*cin, freq*cout)
        sc = np.tile(np.asarray(scale), freq)             # freq-major (f*cout + c)
        sh = np.tile(np.asarray(shift), freq)
        if pool_after:                                    # even freqs first, odd second
            cols = parity_cols(freq, cout)
            band, sc, sh = band[:, :, cols], sc[cols], sh[cols]
        p["w" + name] = jnp.asarray(band)
        p["s" + name] = jnp.asarray(sc).reshape(1, -1).astype(jnp.float32)
        p["b" + name] = jnp.asarray(sh).reshape(1, -1).astype(jnp.float32)
        raw["c" + name] = (w, b, gamma, beta, mean, var)

    F4 = F // 4
    Din = C2 * F4
    w_fc = nrm(keys[i], (O, Din)); i += 1
    b_fc = nrm(keys[i], (O,)); i += 1
    # permute rows: torch feature index c*F4+f  ->  freq-major index f*C2+c
    p["fc_w"] = jnp.transpose(w_fc.reshape(O, C2, F4), (2, 1, 0)).reshape(F4 * C2, O)
    p["fc_b"] = b_fc.reshape(1, O)
    raw["fc_w"], raw["fc_b"] = w_fc, b_fc
    return p, raw


def cast_matmul_params(p, dtype):
    """Cast MXU operands (band + fc weights) to `dtype`; BN affine stays f32."""
    q = dict(p)
    for k in ("w1", "w2", "w3", "fc_w"):
        q[k] = p[k].astype(dtype)
    return q


# ----------------------------------------------------------------------------
# Pure-JAX NCHW reference (mirrors the torch module in eval mode)
# ----------------------------------------------------------------------------
def conv_stack_reference(mel, raw):
    x = mel[:, None, :, :]                                # (B, 1, T, F)

    def block(x, w, b, gamma, beta, mean, var):
        x = jnp.pad(x, ((0, 0), (0, 0), (2, 0), (1, 1)))
        x = lax.conv_general_dilated(x, w, (1, 1), "VALID",
                                     dimension_numbers=("NCHW", "OIHW", "NCHW"),
                                     precision=lax.Precision.HIGHEST)
        x = x + b[None, :, None, None]
        x = (x - mean[None, :, None, None]) / jnp.sqrt(var[None, :, None, None] + 1e-5)
        x = x * gamma[None, :, None, None] + beta[None, :, None, None]
        return jnp.maximum(x, 0.0)

    x = block(x, *raw["c1"])
    x = block(x, *raw["c2"])
    x = lax.reduce_window(x, -jnp.inf, lax.max, (1, 1, 1, 2), (1, 1, 1, 2), "VALID")
    x = block(x, *raw["c3"])
    x = lax.reduce_window(x, -jnp.inf, lax.max, (1, 1, 1, 2), (1, 1, 1, 2), "VALID")
    B, C, T, W = x.shape
    x = jnp.transpose(x, (0, 2, 1, 3)).reshape(B, T, C * W)
    return jnp.dot(x, raw["fc_w"].T, precision=lax.Precision.HIGHEST) + raw["fc_b"]


# ----------------------------------------------------------------------------
if __name__ == "__main__":
    B, T = 2, 8
    input_features, output_features = 16, 64

    key = jax.random.PRNGKey(0)
    kx, kx2, kp = jax.random.split(key, 3)
    params, raw = init_params(kp, input_features, output_features)

    # single-tile case, f32 matmuls: tight check
    mel = jax.random.normal(kx, (B, T, input_features), jnp.float32)
    ref = jax.block_until_ready(conv_stack_reference(mel, raw))
    out = jax.block_until_ready(
        conv_stack_forward(mel, params, input_features, output_features))
    assert out.shape == (B, T, output_features), out.shape
    np.testing.assert_allclose(np.asarray(out), np.asarray(ref), rtol=1e-3, atol=1e-3)

    # multi-time-tile case (exercises the causal carry across tiles), f32: tight check
    T2 = 40
    mel2 = jax.random.normal(kx2, (B, T2, input_features), jnp.float32)
    ref2 = jax.block_until_ready(conv_stack_reference(mel2, raw))
    out2 = jax.block_until_ready(
        conv_stack_forward(mel2, params, input_features, output_features, time_tile=16))
    np.testing.assert_allclose(np.asarray(out2), np.asarray(ref2), rtol=1e-3, atol=1e-3)

    # bf16 matmul operands (v6e/v7x perf config, f32 accumulate): loose check
    params_bf16 = cast_matmul_params(params, jnp.bfloat16)
    out_bf16 = jax.block_until_ready(
        conv_stack_forward(mel2, params_bf16, input_features, output_features, time_tile=16))
    np.testing.assert_allclose(np.asarray(out_bf16), np.asarray(ref2), rtol=5e-2, atol=5e-2)

    print("KERNEL_OK")
</pallas_src>

<mosaic_0001>
module attributes {stable_mosaic.version = 11 : i64} {
  func.func @conv_stack_kernel(%arg0: i32, %arg1: i32, %arg2: memref<1x8x16xf32, #tpu.memory_space<vmem>>, %arg3: memref<3x16x64xf32, #tpu.memory_space<vmem>>, %arg4: memref<1x64xf32, #tpu.memory_space<vmem>>, %arg5: memref<1x64xf32, #tpu.memory_space<vmem>>, %arg6: memref<3x64x64xf32, #tpu.memory_space<vmem>>, %arg7: memref<1x64xf32, #tpu.memory_space<vmem>>, %arg8: memref<1x64xf32, #tpu.memory_space<vmem>>, %arg9: memref<3x32x64xf32, #tpu.memory_space<vmem>>, %arg10: memref<1x64xf32, #tpu.memory_space<vmem>>, %arg11: memref<1x64xf32, #tpu.memory_space<vmem>>, %arg12: memref<32x64xf32, #tpu.memory_space<vmem>>, %arg13: memref<1x64xf32, #tpu.memory_space<vmem>>, %arg14: memref<1x8x64xf32, #tpu.memory_space<vmem>>, %arg15: memref<16x16xf32, #tpu.memory_space<vmem>>, %arg16: memref<16x64xf32, #tpu.memory_space<vmem>>, %arg17: memref<16x32xf32, #tpu.memory_space<vmem>>) attributes {dimension_semantics = [#tpu.dimension_semantics<parallel>, #tpu.dimension_semantics<arbitrary>], iteration_bounds = array<i64: 2, 1>, scalar_prefetch = 0 : i64, scratch_operands = 3 : i64, tpu.core_type = #tpu.core_type<tc>, window_params = [{transform_indices = @transform_0, window_bounds = array<i64: 1, 8, 16>}, {pipeline_mode = #tpu.pipeline_mode<synchronous>, transform_indices = @transform_1, window_bounds = array<i64: 3, 16, 64>}, {pipeline_mode = #tpu.pipeline_mode<synchronous>, transform_indices = @transform_2, window_bounds = array<i64: 1, 64>}, {pipeline_mode = #tpu.pipeline_mode<synchronous>, transform_indices = @transform_3, window_bounds = array<i64: 1, 64>}, {pipeline_mode = #tpu.pipeline_mode<synchronous>, transform_indices = @transform_4, window_bounds = array<i64: 3, 64, 64>}, {pipeline_mode = #tpu.pipeline_mode<synchronous>, transform_indices = @transform_5, window_bounds = array<i64: 1, 64>}, {pipeline_mode = #tpu.pipeline_mode<synchronous>, transform_indices = @transform_6, window_bounds = array<i64: 1, 64>}, {pipeline_mode = #tpu.pipeline_mode<synchronous>, transform_indices = @transform_7, window_bounds = array<i64: 3, 32, 64>}, {pipeline_mode = #tpu.pipeline_mode<synchronous>, transform_indices = @transform_8, window_bounds = array<i64: 1, 64>}, {pipeline_mode = #tpu.pipeline_mode<synchronous>, transform_indices = @transform_9, window_bounds = array<i64: 1, 64>}, {pipeline_mode = #tpu.pipeline_mode<synchronous>, transform_indices = @transform_10, window_bounds = array<i64: 32, 64>}, {pipeline_mode = #tpu.pipeline_mode<synchronous>, transform_indices = @transform_11, window_bounds = array<i64: 1, 64>}, {transform_indices = @transform_12, window_bounds = array<i64: 1, 8, 64>}]} {
    %c0_i32 = arith.constant 0 : i32
    %0 = arith.cmpi eq, %arg1, %c0_i32 : i32
    %1 = arith.extui %0 : i1 to i32
    %c0_i32_0 = arith.constant 0 : i32
    %2 = arith.cmpi ne, %1, %c0_i32_0 : i32
    scf.if %2 {
      %cst_83 = arith.constant 0.000000e+00 : f32
      %103 = vector.broadcast %cst_83 : f32 to vector<8x16xf32>
      %c0_84 = arith.constant 0 : index
      %c0_85 = arith.constant 0 : index
      %104 = vector.load %arg15[%c0_84, %c0_85] : memref<16x16xf32, #tpu.memory_space<vmem>>, vector<8x16xf32>
      tpu.vector_store %arg15[%c0_84, %c0_85], %103 {strides = array<i32>} : memref<16x16xf32, #tpu.memory_space<vmem>>, vector<8x16xf32>,
      %cst_86 = arith.constant 0.000000e+00 : f32
      %105 = vector.broadcast %cst_86 : f32 to vector<8x64xf32>
      %c0_87 = arith.constant 0 : index
      %c0_88 = arith.constant 0 : index
      %106 = vector.load %arg16[%c0_87, %c0_88] : memref<16x64xf32, #tpu.memory_space<vmem>>, vector<8x64xf32>
      tpu.vector_store %arg16[%c0_87, %c0_88], %105 {strides = array<i32>} : memref<16x64xf32, #tpu.memory_space<vmem>>, vector<8x64xf32>,
      %cst_89 = arith.constant 0.000000e+00 : f32
      %107 = vector.broadcast %cst_89 : f32 to vector<8x32xf32>
      %c0_90 = arith.constant 0 : index
      %c0_91 = arith.constant 0 : index
      %108 = vector.load %arg17[%c0_90, %c0_91] : memref<16x32xf32, #tpu.memory_space<vmem>>, vector<8x32xf32>
      tpu.vector_store %arg17[%c0_90, %c0_91], %107 {strides = array<i32>} : memref<16x32xf32, #tpu.memory_space<vmem>>, vector<8x32xf32>,
    } else {
    }
    %c0 = arith.constant 0 : index
    %c0_1 = arith.constant 0 : index
    %c0_2 = arith.constant 0 : index
    %3 = vector.load %arg2[%c0, %c0_1, %c0_2] : memref<1x8x16xf32, #tpu.memory_space<vmem>>, vector<1x8x16xf32>
    %4 = vector.shape_cast %3 : vector<1x8x16xf32> to vector<8x16xf32>
    %c8 = arith.constant 8 : index
    %c0_3 = arith.constant 0 : index
    %5 = vector.load %arg15[%c8, %c0_3] : memref<16x16xf32, #tpu.memory_space<vmem>>, vector<8x16xf32>
    tpu.vector_store %arg15[%c8, %c0_3], %4 {strides = array<i32>} : memref<16x16xf32, #tpu.memory_space<vmem>>, vector<8x16xf32>,
    %c0_4 = arith.constant 0 : index
    %c0_5 = arith.constant 0 : index
    %6 = vector.load %arg15[%c0_4, %c0_5] : memref<16x16xf32, #tpu.memory_space<vmem>>, vector<16x16xf32>
    %cst = arith.constant 0.000000e+00 : f32
    %7 = vector.broadcast %cst : f32 to vector<8x64xf32>
    %8 = vector.extract_strided_slice %6 {offsets = [6, 0], sizes = [8, 16], strides = [1, 1]} : vector<16x16xf32> to vector<8x16xf32>
    %c0_6 = arith.constant 0 : index
    %c0_7 = arith.constant 0 : index
    %c0_8 = arith.constant 0 : index
    %9 = vector.load %arg3[%c0_6, %c0_7, %c0_8] : memref<3x16x64xf32, #tpu.memory_space<vmem>>, vector<1x16x64xf32>
    %10 = vector.shape_cast %9 : vector<1x16x64xf32> to vector<16x64xf32>
    %cst_9 = arith.constant dense<0.000000e+00> : vector<8x64xf32>
    %11 = tpu.matmul %8, %10, %cst_9 {dimension_numbers = #tpu.dot_dimension_numbers<[1], [0], [0], [1], [0, 0, 1, 1], [], []>} : vector<8x16xf32>, vector<16x64xf32>, vector<8x64xf32> -> vector<8x64xf32>
    %12 = arith.addf %7, %11 : vector<8x64xf32>
    %13 = vector.extract_strided_slice %6 {offsets = [7, 0], sizes = [8, 16], strides = [1, 1]} : vector<16x16xf32> to vector<8x16xf32>
    %c1 = arith.constant 1 : index
    %c0_10 = arith.constant 0 : index
    %c0_11 = arith.constant 0 : index
    %14 = vector.load %arg3[%c1, %c0_10, %c0_11] : memref<3x16x64xf32, #tpu.memory_space<vmem>>, vector<1x16x64xf32>
    %15 = vector.shape_cast %14 : vector<1x16x64xf32> to vector<16x64xf32>
    %cst_12 = arith.constant dense<0.000000e+00> : vector<8x64xf32>
    %16 = tpu.matmul %13, %15, %cst_12 {dimension_numbers = #tpu.dot_dimension_numbers<[1], [0], [0], [1], [0, 0, 1, 1], [], []>} : vector<8x16xf32>, vector<16x64xf32>, vector<8x64xf32> -> vector<8x64xf32>
    %17 = arith.addf %12, %16 : vector<8x64xf32>
    %18 = vector.extract_strided_slice %6 {offsets = [8, 0], sizes = [8, 16], strides = [1, 1]} : vector<16x16xf32> to vector<8x16xf32>
    %c2 = arith.constant 2 : index
    %c0_13 = arith.constant 0 : index
    %c0_14 = arith.constant 0 : index
    %19 = vector.load %arg3[%c2, %c0_13, %c0_14] : memref<3x16x64xf32, #tpu.memory_space<vmem>>, vector<1x16x64xf32>
    %20 = vector.shape_cast %19 : vector<1x16x64xf32> to vector<16x64xf32>
    %cst_15 = arith.constant dense<0.000000e+00> : vector<8x64xf32>
    %21 = tpu.matmul %18, %20, %cst_15 {dimension_numbers = #tpu.dot_dimension_numbers<[1], [0], [0], [1], [0, 0, 1, 1], [], []>} : vector<8x16xf32>, vector<16x64xf32>, vector<8x64xf32> -> vector<8x64xf32>
    %22 = arith.addf %17, %21 : vector<8x64xf32>
    %c0_16 = arith.constant 0 : index
    %c0_17 = arith.constant 0 : index
    %23 = vector.load %arg4[%c0_16, %c0_17] : memref<1x64xf32, #tpu.memory_space<vmem>>, vector<1x64xf32>
    %24 = vector.broadcast %23 : vector<1x64xf32> to vector<8x64xf32>
    %25 = arith.mulf %22, %24 : vector<8x64xf32>
    %c0_18 = arith.constant 0 : index
    %c0_19 = arith.constant 0 : index
    %26 = vector.load %arg5[%c0_18, %c0_19] : memref<1x64xf32, #tpu.memory_space<vmem>>, vector<1x64xf32>
    %27 = vector.broadcast %26 : vector<1x64xf32> to vector<8x64xf32>
    %28 = arith.addf %25, %27 : vector<8x64xf32>
    %cst_20 = arith.constant 0.000000e+00 : f32
    %29 = vector.broadcast %cst_20 : f32 to vector<8x64xf32>
    %30 = arith.maximumf %28, %29 : vector<8x64xf32>
    %c8_21 = arith.constant 8 : index
    %c0_22 = arith.constant 0 : index
    %31 = vector.load %arg16[%c8_21, %c0_22] : memref<16x64xf32, #tpu.memory_space<vmem>>, vector<8x64xf32>
    tpu.vector_store %arg16[%c8_21, %c0_22], %30 {strides = array<i32>} : memref<16x64xf32, #tpu.memory_space<vmem>>, vector<8x64xf32>,
    %c0_23 = arith.constant 0 : index
    %c0_24 = arith.constant 0 : index
    %32 = vector.load %arg16[%c0_23, %c0_24] : memref<16x64xf32, #tpu.memory_space<vmem>>, vector<16x64xf32>
    %cst_25 = arith.constant 0.000000e+00 : f32
    %33 = vector.broadcast %cst_25 : f32 to vector<8x64xf32>
    %34 = vector.extract_strided_slice %32 {offsets = [6, 0], sizes = [8, 64], strides = [1, 1]} : vector<16x64xf32> to vector<8x64xf32>
    %c0_26 = arith.constant 0 : index
    %c0_27 = arith.constant 0 : index
    %c0_28 = arith.constant 0 : index
    %35 = vector.load %arg6[%c0_26, %c0_27, %c0_28] : memref<3x64x64xf32, #tpu.memory_space<vmem>>, vector<1x64x64xf32>
    %36 = vector.shape_cast %35 : vector<1x64x64xf32> to vector<64x64xf32>
    %cst_29 = arith.constant dense<0.000000e+00> : vector<8x64xf32>
    %37 = tpu.matmul %34, %36, %cst_29 {dimension_numbers = #tpu.dot_dimension_numbers<[1], [0], [0], [1], [0, 0, 1, 1], [], []>} : vector<8x64xf32>, vector<64x64xf32>, vector<8x64xf32> -> vector<8x64xf32>
    %38 = arith.addf %33, %37 : vector<8x64xf32>
    %39 = vector.extract_strided_slice %32 {offsets = [7, 0], sizes = [8, 64], strides = [1, 1]} : vector<16x64xf32> to vector<8x64xf32>
    %c1_30 = arith.constant 1 : index
    %c0_31 = arith.constant 0 : index
    %c0_32 = arith.constant 0 : index
    %40 = vector.load %arg6[%c1_30, %c0_31, %c0_32] : memref<3x64x64xf32, #tpu.memory_space<vmem>>, vector<1x64x64xf32>
    %41 = vector.shape_cast %40 : vector<1x64x64xf32> to vector<64x64xf32>
    %cst_33 = arith.constant dense<0.000000e+00> : vector<8x64xf32>
    %42 = tpu.matmul %39, %41, %cst_33 {dimension_numbers = #tpu.dot_dimension_numbers<[1], [0], [0], [1], [0, 0, 1, 1], [], []>} : vector<8x64xf32>, vector<64x64xf32>, vector<8x64xf32> -> vector<8x64xf32>
    %43 = arith.addf %38, %42 : vector<8x64xf32>
    %44 = vector.extract_strided_slice %32 {offsets = [8, 0], sizes = [8, 64], strides = [1, 1]} : vector<16x64xf32> to vector<8x64xf32>
    %c2_34 = arith.constant 2 : index
    %c0_35 = arith.constant 0 : index
    %c0_36 = arith.constant 0 : index
    %45 = vector.load %arg6[%c2_34, %c0_35, %c0_36] : memref<3x64x64xf32, #tpu.memory_space<vmem>>, vector<1x64x64xf32>
    %46 = vector.shape_cast %45 : vector<1x64x64xf32> to vector<64x64xf32>
    %cst_37 = arith.constant dense<0.000000e+00> : vector<8x64xf32>
    %47 = tpu.matmul %44, %46, %cst_37 {dimension_numbers = #tpu.dot_dimension_numbers<[1], [0], [0], [1], [0, 0, 1, 1], [], []>} : vector<8x64xf32>, vector<64x64xf32>, vector<8x64xf32> -> vector<8x64xf32>
    %48 = arith.addf %43, %47 : vector<8x64xf32>
    %c0_38 = arith.constant 0 : index
    %c0_39 = arith.constant 0 : index
    %49 = vector.load %arg7[%c0_38, %c0_39] : memref<1x64xf32, #tpu.memory_space<vmem>>, vector<1x64xf32>
    %50 = vector.broadcast %49 : vector<1x64xf32> to vector<8x64xf32>
    %51 = arith.mulf %48, %50 : vector<8x64xf32>
    %c0_40 = arith.constant 0 : index
    %c0_41 = arith.constant 0 : index
    %52 = vector.load %arg8[%c0_40, %c0_41] : memref<1x64xf32, #tpu.memory_space<vmem>>, vector<1x64xf32>
    %53 = vector.broadcast %52 : vector<1x64xf32> to vector<8x64xf32>
    %54 = arith.addf %51, %53 : vector<8x64xf32>
    %cst_42 = arith.constant 0.000000e+00 : f32
    %55 = vector.broadcast %cst_42 : f32 to vector<8x64xf32>
    %56 = arith.maximumf %54, %55 : vector<8x64xf32>
    %57 = vector.extract_strided_slice %56 {offsets = [0, 0], sizes = [8, 32], strides = [1, 1]} : vector<8x64xf32> to vector<8x32xf32>
    %58 = vector.extract_strided_slice %56 {offsets = [0, 32], sizes = [8, 32], strides = [1, 1]} : vector<8x64xf32> to vector<8x32xf32>
    %59 = arith.maximumf %57, %58 : vector<8x32xf32>
    %c8_43 = arith.constant 8 : index
    %c0_44 = arith.constant 0 : index
    %60 = vector.load %arg17[%c8_43, %c0_44] : memref<16x32xf32, #tpu.memory_space<vmem>>, vector<8x32xf32>
    tpu.vector_store %arg17[%c8_43, %c0_44], %59 {strides = array<i32>} : memref<16x32xf32, #tpu.memory_space<vmem>>, vector<8x32xf32>,
    %c0_45 = arith.constant 0 : index
    %c0_46 = arith.constant 0 : index
    %61 = vector.load %arg17[%c0_45, %c0_46] : memref<16x32xf32, #tpu.memory_space<vmem>>, vector<16x32xf32>
    %cst_47 = arith.constant 0.000000e+00 : f32
    %62 = vector.broadcast %cst_47 : f32 to vector<8x64xf32>
    %63 = vector.extract_strided_slice %61 {offsets = [6, 0], sizes = [8, 32], strides = [1, 1]} : vector<16x32xf32> to vector<8x32xf32>
    %c0_48 = arith.constant 0 : index
    %c0_49 = arith.constant 0 : index
    %c0_50 = arith.constant 0 : index
    %64 = vector.load %arg9[%c0_48, %c0_49, %c0_50] : memref<3x32x64xf32, #tpu.memory_space<vmem>>, vector<1x32x64xf32>
    %65 = vector.shape_cast %64 : vector<1x32x64xf32> to vector<32x64xf32>
    %cst_51 = arith.constant dense<0.000000e+00> : vector<8x64xf32>
    %66 = tpu.matmul %63, %65, %cst_51 {dimension_numbers = #tpu.dot_dimension_numbers<[1], [0], [0], [1], [0, 0, 1, 1], [], []>} : vector<8x32xf32>, vector<32x64xf32>, vector<8x64xf32> -> vector<8x64xf32>
    %67 = arith.addf %62, %66 : vector<8x64xf32>
    %68 = vector.extract_strided_slice %61 {offsets = [7, 0], sizes = [8, 32], strides = [1, 1]} : vector<16x32xf32> to vector<8x32xf32>
    %c1_52 = arith.constant 1 : index
    %c0_53 = arith.constant 0 : index
    %c0_54 = arith.constant 0 : index
    %69 = vector.load %arg9[%c1_52, %c0_53, %c0_54] : memref<3x32x64xf32, #tpu.memory_space<vmem>>, vector<1x32x64xf32>
    %70 = vector.shape_cast %69 : vector<1x32x64xf32> to vector<32x64xf32>
    %cst_55 = arith.constant dense<0.000000e+00> : vector<8x64xf32>
    %71 = tpu.matmul %68, %70, %cst_55 {dimension_numbers = #tpu.dot_dimension_numbers<[1], [0], [0], [1], [0, 0, 1, 1], [], []>} : vector<8x32xf32>, vector<32x64xf32>, vector<8x64xf32> -> vector<8x64xf32>
    %72 = arith.addf %67, %71 : vector<8x64xf32>
    %73 = vector.extract_strided_slice %61 {offsets = [8, 0], sizes = [8, 32], strides = [1, 1]} : vector<16x32xf32> to vector<8x32xf32>
    %c2_56 = arith.constant 2 : index
    %c0_57 = arith.constant 0 : index
    %c0_58 = arith.constant 0 : index
    %74 = vector.load %arg9[%c2_56, %c0_57, %c0_58] : memref<3x32x64xf32, #tpu.memory_space<vmem>>, vector<1x32x64xf32>
    %75 = vector.shape_cast %74 : vector<1x32x64xf32> to vector<32x64xf32>
    %cst_59 = arith.constant dense<0.000000e+00> : vector<8x64xf32>
    %76 = tpu.matmul %73, %75, %cst_59 {dimension_numbers = #tpu.dot_dimension_numbers<[1], [0], [0], [1], [0, 0, 1, 1], [], []>} : vector<8x32xf32>, vector<32x64xf32>, vector<8x64xf32> -> vector<8x64xf32>
    %77 = arith.addf %72, %76 : vector<8x64xf32>
    %c0_60 = arith.constant 0 : index
    %c0_61 = arith.constant 0 : index
    %78 = vector.load %arg10[%c0_60, %c0_61] : memref<1x64xf32, #tpu.memory_space<vmem>>, vector<1x64xf32>
    %79 = vector.broadcast %78 : vector<1x64xf32> to vector<8x64xf32>
    %80 = arith.mulf %77, %79 : vector<8x64xf32>
    %c0_62 = arith.constant 0 : index
    %c0_63 = arith.constant 0 : index
    %81 = vector.load %arg11[%c0_62, %c0_63] : memref<1x64xf32, #tpu.memory_space<vmem>>, vector<1x64xf32>
    %82 = vector.broadcast %81 : vector<1x64xf32> to vector<8x64xf32>
    %83 = arith.addf %80, %82 : vector<8x64xf32>
    %cst_64 = arith.constant 0.000000e+00 : f32
    %84 = vector.broadcast %cst_64 : f32 to vector<8x64xf32>
    %85 = arith.maximumf %83, %84 : vector<8x64xf32>
    %86 = vector.extract_strided_slice %85 {offsets = [0, 0], sizes = [8, 32], strides = [1, 1]} : vector<8x64xf32> to vector<8x32xf32>
    %87 = vector.extract_strided_slice %85 {offsets = [0, 32], sizes = [8, 32], strides = [1, 1]} : vector<8x64xf32> to vector<8x32xf32>
    %88 = arith.maximumf %86, %87 : vector<8x32xf32>
    %c0_65 = arith.constant 0 : index
    %c0_66 = arith.constant 0 : index
    %89 = vector.load %arg12[%c0_65, %c0_66] : memref<32x64xf32, #tpu.memory_space<vmem>>, vector<32x64xf32>
    %cst_67 = arith.constant dense<0.000000e+00> : vector<8x64xf32>
    %90 = tpu.matmul %88, %89, %cst_67 {dimension_numbers = #tpu.dot_dimension_numbers<[1], [0], [0], [1], [0, 0, 1, 1], [], []>} : vector<8x32xf32>, vector<32x64xf32>, vector<8x64xf32> -> vector<8x64xf32>
    %c0_68 = arith.constant 0 : index
    %c0_69 = arith.constant 0 : index
    %91 = vector.load %arg13[%c0_68, %c0_69] : memref<1x64xf32, #tpu.memory_space<vmem>>, vector<1x64xf32>
    %92 = vector.broadcast %91 : vector<1x64xf32> to vector<8x64xf32>
    %93 = arith.addf %90, %92 : vector<8x64xf32>
    %c0_70 = arith.constant 0 : index
    %c0_71 = arith.constant 0 : index
    %c0_72 = arith.constant 0 : index
    %94 = vector.load %arg14[%c0_70, %c0_71, %c0_72] : memref<1x8x64xf32, #tpu.memory_space<vmem>>, vector<1x8x64xf32>
    %95 = vector.shape_cast %94 : vector<1x8x64xf32> to vector<8x64xf32>
    %96 = vector.shape_cast %93 : vector<8x64xf32> to vector<1x8x64xf32>
    tpu.vector_store %arg14[%c0_70, %c0_71, %c0_72], %96 {strides = array<i32>} : memref<1x8x64xf32, #tpu.memory_space<vmem>>, vector<1x8x64xf32>,
    %c14 = arith.constant 14 : index
    %c0_73 = arith.constant 0 : index
    %97 = vector.load %arg15[%c14, %c0_73] : memref<16x16xf32, #tpu.memory_space<vmem>>, vector<2x16xf32>
    %c6 = arith.constant 6 : index
    %c0_74 = arith.constant 0 : index
    %98 = vector.load %arg15[%c6, %c0_74] : memref<16x16xf32, #tpu.memory_space<vmem>>, vector<2x16xf32>
    tpu.vector_store %arg15[%c6, %c0_74], %97 {strides = array<i32>} : memref<16x16xf32, #tpu.memory_space<vmem>>, vector<2x16xf32>,
    %c14_75 = arith.constant 14 : index
    %c0_76 = arith.constant 0 : index
    %99 = vector.load %arg16[%c14_75, %c0_76] : memref<16x64xf32, #tpu.memory_space<vmem>>, vector<2x64xf32>
    %c6_77 = arith.constant 6 : index
    %c0_78 = arith.constant 0 : index
    %100 = vector.load %arg16[%c6_77, %c0_78] : memref<16x64xf32, #tpu.memory_space<vmem>>, vector<2x64xf32>
    tpu.vector_store %arg16[%c6_77, %c0_78], %99 {strides = array<i32>} : memref<16x64xf32, #tpu.memory_space<vmem>>, vector<2x64xf32>,
    %c14_79 = arith.constant 14 : index
    %c0_80 = arith.constant 0 : index
    %101 = vector.load %arg17[%c14_79, %c0_80] : memref<16x32xf32, #tpu.memory_space<vmem>>, vector<2x32xf32>
    %c6_81 = arith.constant 6 : index
    %c0_82 = arith.constant 0 : index
    %102 = vector.load %arg17[%c6_81, %c0_82] : memref<16x32xf32, #tpu.memory_space<vmem>>, vector<2x32xf32>
    tpu.vector_store %arg17[%c6_81, %c0_82], %101 {strides = array<i32>} : memref<16x32xf32, #tpu.memory_space<vmem>>, vector<2x32xf32>,
    return
  }
  func.func @transform_0(%arg0: i32, %arg1: i32) -> (i32, i32, i32) {
    %c0_i32 = arith.constant 0 : i32
    %c0_i32_0 = arith.constant 0 : i32
    return %arg0, %arg1, %c0_i32 : i32, i32, i32
  }
  func.func @transform_1(%arg0: i32, %arg1: i32) -> (i32, i32, i32) {
    %c0_i32 = arith.constant 0 : i32
    %c0_i32_0 = arith.constant 0 : i32
    %c0_i32_1 = arith.constant 0 : i32
    %c0_i32_2 = arith.constant 0 : i32
    return %c0_i32, %c0_i32_0, %c0_i32_1 : i32, i32, i32
  }
  func.func @transform_2(%arg0: i32, %arg1: i32) -> (i32, i32) {
    %c0_i32 = arith.constant 0 : i32
    %c0_i32_0 = arith.constant 0 : i32
    %c0_i32_1 = arith.constant 0 : i32
    return %c0_i32, %c0_i32_0 : i32, i32
  }
  func.func @transform_3(%arg0: i32, %arg1: i32) -> (i32, i32) {
    %c0_i32 = arith.constant 0 : i32
    %c0_i32_0 = arith.constant 0 : i32
    %c0_i32_1 = arith.constant 0 : i32
    return %c0_i32, %c0_i32_0 : i32, i32
  }
  func.func @transform_4(%arg0: i32, %arg1: i32) -> (i32, i32, i32) {
    %c0_i32 = arith.constant 0 : i32
    %c0_i32_0 = arith.constant 0 : i32
    %c0_i32_1 = arith.constant 0 : i32
    %c0_i32_2 = arith.constant 0 : i32
    return %c0_i32, %c0_i32_0, %c0_i32_1 : i32, i32, i32
  }
  func.func @transform_5(%arg0: i32, %arg1: i32) -> (i32, i32) {
    %c0_i32 = arith.constant 0 : i32
    %c0_i32_0 = arith.constant 0 : i32
    %c0_i32_1 = arith.constant 0 : i32
    return %c0_i32, %c0_i32_0 : i32, i32
  }
  func.func @transform_6(%arg0: i32, %arg1: i32) -> (i32, i32) {
    %c0_i32 = arith.constant 0 : i32
    %c0_i32_0 = arith.constant 0 : i32
    %c0_i32_1 = arith.constant 0 : i32
    return %c0_i32, %c0_i32_0 : i32, i32
  }
  func.func @transform_7(%arg0: i32, %arg1: i32) -> (i32, i32, i32) {
    %c0_i32 = arith.constant 0 : i32
    %c0_i32_0 = arith.constant 0 : i32
    %c0_i32_1 = arith.constant 0 : i32
    %c0_i32_2 = arith.constant 0 : i32
    return %c0_i32, %c0_i32_0, %c0_i32_1 : i32, i32, i32
  }
  func.func @transform_8(%arg0: i32, %arg1: i32) -> (i32, i32) {
    %c0_i32 = arith.constant 0 : i32
    %c0_i32_0 = arith.constant 0 : i32
    %c0_i32_1 = arith.constant 0 : i32
    return %c0_i32, %c0_i32_0 : i32, i32
  }
  func.func @transform_9(%arg0: i32, %arg1: i32) -> (i32, i32) {
    %c0_i32 = arith.constant 0 : i32
    %c0_i32_0 = arith.constant 0 : i32
    %c0_i32_1 = arith.constant 0 : i32
    return %c0_i32, %c0_i32_0 : i32, i32
  }
  func.func @transform_10(%arg0: i32, %arg1: i32) -> (i32, i32) {
    %c0_i32 = arith.constant 0 : i32
    %c0_i32_0 = arith.constant 0 : i32
    %c0_i32_1 = arith.constant 0 : i32
    return %c0_i32, %c0_i32_0 : i32, i32
  }
  func.func @transform_11(%arg0: i32, %arg1: i32) -> (i32, i32) {
    %c0_i32 = arith.constant 0 : i32
    %c0_i32_0 = arith.constant 0 : i32
    %c0_i32_1 = arith.constant 0 : i32
    return %c0_i32, %c0_i32_0 : i32, i32
  }
  func.func @transform_12(%arg0: i32, %arg1: i32) -> (i32, i32, i32) {
    %c0_i32 = arith.constant 0 : i32
    %c0_i32_0 = arith.constant 0 : i32
    return %arg0, %arg1, %c0_i32 : i32, i32, i32
  }
}

</mosaic_0001>

<bundles_post_ra>
// kernel: tpu_custom_call.1
= control target key start
LH: loop header
LB: loop body
LE: loop exit
PB: predicated region body
PF: predicated region fallthrough
CT: control target
= control target key end

     0   :  { %s1710_s0 = inlined_call_operand.hbm [shape: f32[2,8,16], index: 0, kind: input, shape index: {}]   ;;  %s1711_s1 = inlined_call_operand.hbm [shape: f32[3,16,64], index: 1, kind: input, shape index: {}]   ;;  %s1712_s2 = inlined_call_operand.vmem [shape: f32[1,64], index: 2, kind: input, shape index: {}]   ;;  %s1713_s3 = inlined_call_operand.vmem [shape: f32[1,64], index: 3, kind: input, shape index: {}]   ;;  %s1714_s4 = inlined_call_operand.hbm [shape: f32[3,64,64], index: 4, kind: input, shape index: {}]   ;;  %s1715_s5 = inlined_call_operand.vmem [shape: f32[1,64], index: 5, kind: input, shape index: {}]   ;;  %s1716_s6 = inlined_call_operand.vmem [shape: f32[1,64], index: 6, kind: input, shape index: {}]   ;;  %s1717_s7 = inlined_call_operand.hbm [shape: f32[3,32,64], index: 7, kind: input, shape index: {}]   ;;  %s1718_s8 = inlined_call_operand.vmem [shape: f32[1,64], index: 8, kind: input, shape index: {}]   ;;  %s1719_s9 = inlined_call_operand.vmem [shape: f32[1,64], index: 9, kind: input, shape index: {}]   ;;  %s1720_s10 = inlined_call_operand.hbm [shape: f32[32,64], index: 10, kind: input, shape index: {}]   ;;  %s1721_s11 = inlined_call_operand.vmem [shape: f32[1,64], index: 11, kind: input, shape index: {}]   ;;  %s1722_s12 = inlined_call_operand.hbm [shape: f32[2,8,64], index: 12, kind: output, shape index: {}]  }
   0x1   :  { %1725 = sst [smem:[#allocation19_spill]] %s1711_s1 }
   0x2   :  { %1726 = sst [smem:[#allocation20_spill]] %s1714_s4 }
   0x3   :  { %1727 = sst [smem:[#allocation21_spill]] %s1717_s7 }
   0x4   :  { %1728 = sst [smem:[#allocation22_spill]] %s1720_s10 }
   0x5   :  { %1729 = sst [smem:[#allocation23_spill]] %s1721_s11 }
   0x6   :  { %1730 = sst [smem:[#allocation24_spill]] %s1722_s12 }
   0x7   :  { %17 = vsyncpa [#allocation6], 0 }
   0x8   :  { %19 = vsyncpa [#allocation6 + $0x1], 0 }
   0x9   :  { %20 = vsyncpa [#allocation9], 0 }
   0xa   :  { %21 = vsyncpa [#allocation12], 0 }
   0xb   :  { %22 = vsyncpa [#allocation7], 0 }
   0xc   :  { %24 = vsyncpa [#allocation7 + $0x1], 0  ;;  %s1491_s21 = smov 0   ;;  %s1493_s22 = smov 0  }
   0xd   :  { %s1495_s23 = smov 0   ;;  %s1497_s24 = smov 0  }
   0xe   :  { %s1499_s25 = smov 0   ;;  %s1501_s26 = smov 0  }
   0xf LB: > { %s1723_s27 = sadd.s32 4294967295, %s1416_s26   ;;  %p1033_p0 = scmp.ge.s32.totalorder %s1416_s26, 1  ;;  %s1416_s26 = sphi %s1501_s26, %s30_s26   ;;  %s1412_s25 = sphi %s1499_s25, %s1748_s25   ;;  %s1408_s24 = sphi %s1497_s24, %s1747_s24   ;;  %s1404_s23 = sphi %s1495_s23, %s1746_s23   ;;  %s1400_s22 = sphi %s1493_s22, %s1745_s22   ;;  %s1396_s21 = sphi %s1491_s21, %s1744_s21  }
  0x10   : > { %p1525_p1 = scmp.eq.s32.totalorder %s1723_s27, 0  ;;  %p334_p2 = scmp.lt.s32.totalorder %s1416_s26, 3 }
  0x11   : > { %s1732_s1 = sld [smem:[#allocation19_spill]]  ;;  %s1418_s15 = smov [#allocation8]  }
  0x12   : > { %p1533_p3 = pnand %p1033_p0, %p334_p2  ;;  %s347_s16 = sshll.u32 %s1418_s15, 4  ;;  %s348_s16 = int_to_ptr.vmem [resolvable:$true] %s347_s16 }
  0x13   : > { %p1038_p6 = scmp.ge.s32.totalorder %s1416_s26, 2  ;;  %s1735_s7 = sld [smem:[#allocation21_spill]] }
  0x14   : > { %p1082_p4 = pneg %p1533_p3  ;;  %s1419_s29 = smov 128  }
  0x15   : > { %s1420_s30 = smov 8   ;;  %s1421_s15 = smov [#allocation11]  }
  0x16   : > { %p1541_p5 = pnand %p1082_p4, %p1525_p1  ;;  %s387_s27 = sshll.u32 %s1421_s15, 4  ;;  %s388_s27 = int_to_ptr.vmem [resolvable:$true] %s387_s27 }
  0x17   : > { %s345_s13 = sshll.u32 %s1732_s1, 4  ;;  %s1736_s4 = sld [smem:[#allocation20_spill]]  ;;  %s346_s13 = int_to_ptr.hbm [resolvable:$true] %s345_s13 }
  0x18   : > { %1085 = dma.hbm_to_vmem [thread:$0]  (!%p1541_p5), %s346_s13, 768, %s348_s16, [#allocation9], %s1419_s29, %s1419_s29, %s1420_s30  }
  0x19   : > { %s385_s20 = sshll.u32 %s1735_s7, 4  ;;  %s1737_s10 = sld [smem:[#allocation22_spill]]  ;;  %s386_s20 = int_to_ptr.hbm [resolvable:$true] %s385_s20 }
  0x1a   : > { %1091 = dma.hbm_to_vmem [thread:$0]  (!%p1541_p5), %s386_s20, 1536, %s388_s27, [#allocation12], %s1419_s29, %s1419_s29, %s1420_s30  }
  0x1b   : > { %s1422_s16 = smov [#allocation10]   ;;  %s1423_s1 = smov [#allocation13]  }
  0x1c   : > { %s367_s15 = sshll.u32 %s1422_s16, 4  ;;  %s407_s11 = sshll.u32 %s1423_s1, 4  ;;  %s368_s15 = int_to_ptr.vmem [resolvable:$true] %s367_s15  ;;  %s408_s11 = int_to_ptr.vmem [resolvable:$true] %s407_s11 }
  0x1d   : > { %s365_s12 = sshll.u32 %s1736_s4, 4  ;;  %s42_s27 = sadd.s32 1, %s1412_s25  ;;  %s366_s12 = int_to_ptr.hbm [resolvable:$true] %s365_s12 }
  0x1e   : > { %1088 = dma.hbm_to_vmem [thread:$0]  (!%p1541_p5), %s366_s12, 3072, %s368_s15, [#allocation9], %s1419_s29, %s1419_s29, %s1420_s30  }
  0x1f   : > { %s405_s13 = sshll.u32 %s1737_s10, 4  ;;  %s1032_s20 = sadd.s32 4294967294, %s1416_s26   ;;  %s406_s13 = int_to_ptr.hbm [resolvable:$true] %s405_s13 }
  0x20   : > { %1094 = dma.hbm_to_vmem [thread:$0]  (!%p1541_p5), %s406_s13, 512, %s408_s11, [#allocation12], %s1419_s29, %s1419_s29, %s1420_s30  }
  0x21   : > { %p44_p7 = scmp.ge.s32.totalorder %s42_s27, 2  ;;  %s51_s18 = sadd.s32 1, %s1404_s23 }
  0x22   : > { %p58_p8 = scmp.ne.s32.totalorder %s1404_s23, %s1400_s22  ;;  %p59_p9 = scmp.eq.s32.totalorder %s1416_s26, 0 }
  0x23   : > { %s1750_s27 = smov (%p44_p7, %s42_s27), 0  ;;  %p64_p10 = scmp.ne.s32.totalorder %s1400_s22, %s1396_s21 }
  0x24   : > { %s46_s12 = ssub.s32 %s1412_s25, %s1750_s27  ;;  %s1738_s19 = sadd.s32 4294967295, %s1416_s26  }
  0x25   : > { %p321_p11 = scmp.eq.s32.totalorder %s1738_s19, 1  ;;  %p49_p12 = scmp.eq.s32.totalorder %s46_s12, 0 }
  0x26   : > { %p1579_p13 = por %p1525_p1, %p64_p10  ;;  %p327_p2 = scmp.eq.s32.totalorder %s1032_s20, 1 }
  0x27   : > { %p1583_p0 = por %p321_p11, %p58_p8  ;;  %p60_p4 = por %p59_p9, %p58_p8 }
  0x28   : > { %s1588_s30 = scalar_select %p49_p12, %s1404_s23, %s51_s18  }
  0x29   : > { %p1590_p5 = por %p327_p2, %p64_p10  ;;  %s424_s16 = sand.u32 1, %s1404_s23  }
  0x2a   : > { %s1040_s15 = sshll.u32 %s1412_s25, 3  ;;  %p1107_p7 = scmp.lt.s32.totalorder %s1416_s26, 2 }
  0x2b   : > { %s1039_s1 = sshll.u32 %s424_s16, 3  ;;  %s433_s19 = scalar_lea.hbm %s1710_s0, %s1040_s15 }
  0x2c   : > { %s435_s4 = sshll.u32 %s433_s19, 4  ;;  %s428_s7 = scalar_lea.vmem [#allocation5], %s1039_s1  ;;  %s436_s4 = int_to_ptr.hbm [resolvable:$true] %s435_s4 }
  0x2d   : > { %s437_s10 = sshll.u32 %s428_s7, 4  ;;  %p1096_p11 = pnand %p1107_p7, %p60_p4  ;;  %s438_s10 = int_to_ptr.vmem [resolvable:$true] %s437_s10 }
  0x2e   : > { %s425_s20 = scalar_lea.sflag [#allocation6], %s424_s16  ;;  %446 = sbr.rel (%p1533_p3) target bundleno = 885 (0x375), region = 68 }
  0x2f   : > { %1098 = dma.hbm_to_vmem [thread:$0]  (!%p1096_p11), %s436_s4, 128, %s438_s10, %s425_s20  }
  0x30   : > { %s1603_s18 = sand.u32 (!%p1533_p3), 1, %s1400_s22  }
  0x31   : > { %s1042_s11 = sshll.u32 (!%p1533_p3), %s1603_s18, 3  ;;  %s449_s15 = scalar_lea.sflag (!%p1533_p3), [#allocation6], %s1603_s18 }
  0x32   : > { %s452_s1 = scalar_lea.vmem (!%p1533_p3), [#allocation5], %s1042_s11 }
  0x33   : > { %1379 = dma.done.wait (%p1579_p13), %s449_s15, 128  }
  0x34   : > { %1381 = vsyncadd (%p1579_p13), %s449_s15, 4294967168 }
  0x35   : > { %1383 = dma.done.wait (%p1525_p1), [#allocation9], 3840  }
  0x36   : > { %1385 = vsyncadd (%p1525_p1), [#allocation9], 4294963456 }
  0x37   : > { %1387 = dma.done.wait (%p1525_p1), [#allocation12], 2048  }
  0x38   : > { %1389 = vsyncadd (%p1525_p1), [#allocation12], 4294965248  ;;  %vm518_vm0 = vcmask 130048   ;;  %v1424_v0 = vmov 0.0   ;;  %v590_v1 = vld [vmem:[#allocation8 + $0x28] sm:$0xff]  ;;  %v589_v2 = vld [vmem:[#allocation8 + $0x20] sm:$0xff] }
  0x39   : > { %519 = vst.msk [vmem:[#allocation2] sm:$0xff] %vm518_vm0, %v1424_v0  ;;  %v524_v3 = vld [vmem:[%s452_s1] sm:$0xff]  ;;  %607 = vmatpush.msra.mxu2 %v590_v1  ;;  %v530_v5 = vld [vmem:[#allocation8 + $0x8] sm:$0xff]  ;;  %v529_v7 = vld [vmem:[#allocation8] sm:$0xff]  ;;  %vm888_vm1 = vcmask 123904   ;;  %vm536_vm2 = vcmask 1040384  }
  0x3a   : > { %526 = vst.msk [vmem:[#allocation2 + $0x8] sm:$0xff] %vm518_vm0, %v524_v3  ;;  %v533_v4 = vld [vmem:[#allocation8 + $0x18] sm:$0xff]  ;;  %v532_v6 = vld [vmem:[#allocation8 + $0x10] sm:$0xff]  ;;  %582 = vmatpush.msra.mxu1 %v530_v5  ;;  %vm562_vm3 = vcmask 1041408   ;;  %v706_v17 = vld [vmem:[#allocation10 + $0xb8] sm:$0xff]  ;;  %vm520_vm4 = vcmask 523264  }
  0x3b   : > { %556 = vmatpush.msra.mxu0 %v533_v4  ;;  %608 = vmatpush.msra.mxu2 %v589_v2  ;;  %v705_v18 = vld [vmem:[#allocation10 + $0xb0] sm:$0xff]  ;;  %v645_v19 = vld [vmem:[#allocation10 + $0x78] sm:$0xff]  ;;  %v704_v21 = vld [vmem:[#allocation10 + $0xa8] sm:$0xff]  ;;  %521 = vst.msk [vmem:[#allocation3] sm:$0xff] %vm520_vm4, %v1424_v0  ;;  %vm891_vm5 = vcmask 517120   ;;  %vm522_vm6 = vcmask 261120  }
  0x3c   : > { %583 = vmatpush.msra.mxu1 %v529_v7  ;;  %v636_v20 = vld [vmem:[#allocation10 + $0x38] sm:$0xff]  ;;  %661 = vmatpush.msra.mxu3 %v645_v19  ;;  %v644_v22 = vld [vmem:[#allocation10 + $0x70] sm:$0xff]  ;;  %v703_v24 = vld [vmem:[#allocation10 + $0xa0] sm:$0xff]  ;;  %523 = vst.msk [vmem:[#allocation4] sm:$0xff] %vm522_vm6, %v1424_v0  ;;  %s1425_s19 = smov 96   ;;  %vm894_vm7 = vcmask 254976  }
  0x3d   : > { %557 = vmatpush.msra.mxu0 %v532_v6  ;;  %v635_v23 = vld [vmem:[#allocation10 + $0x30] sm:$0xff]  ;;  %v643_v25 = vld [vmem:[#allocation10 + $0x68] sm:$0xff]  ;;  %v702_v27 = vld [vmem:[#allocation10 + $0x98] sm:$0xff]  ;;  %s1059_s7 = sshll.u32 %s1408_s24, 3  ;;  %s1742_s14 = sld [smem:[#allocation24_spill]] }
  0x3e   : > { %717 = vmatpush.msrb.mxu1 %v706_v17  ;;  %662 = vmatpush.msra.mxu3 %v644_v22  ;;  %v634_v26 = vld [vmem:[#allocation10 + $0x28] sm:$0xff]  ;;  %v642_v28 = vld [vmem:[#allocation10 + $0x60] sm:$0xff]  ;;  %v701_v30 = vld [vmem:[#allocation10 + $0x90] sm:$0xff]  ;;  %s1743_s20 = sld [smem:[#allocation23_spill]]  ;;  %s513_s15 = scalar_lea.vmem [#allocation14], %s1042_s11 }
  0x3f   : > { %686 = vmatpush.msrb.mxu0 %v636_v20  ;;  %v633_v29 = vld [vmem:[#allocation10 + $0x20] sm:$0xff]  ;;  %v641_v31 = vld [vmem:[#allocation10 + $0x58] sm:$0xff]  ;;  %v700_v33 = vld [vmem:[#allocation10 + $0x88] sm:$0xff]  ;;  %s897_s24 = scalar_lea.sflag [#allocation7], %s1603_s18 }
  0x40   : > { %v527_v8 = vld [vmem:[#allocation2] sm:$0xff]  ;;  %718 = vmatpush.msrb.mxu1 %v705_v18  ;;  %663 = vmatpush.msra.mxu3 %v643_v25  ;;  %v632_v32 = vld [vmem:[#allocation10 + $0x18] sm:$0xff]  ;;  %v699_v36 = vld [vmem:[#allocation10 + $0x80] sm:$0xff] }
  0x41   : > { %v537_v9 = vrot.slane %v527_v8, 7  ;;  %v563_v10 = vrot.slane %v527_v8, 6  ;;  %v528_v11 = vld [vmem:[#allocation2 + $0x8] sm:$0xff]  ;;  %687 = vmatpush.msrb.mxu0 %v635_v23  ;;  %v640_v34 = vld [vmem:[#allocation10 + $0x50] sm:$0xff]  ;;  %v639_v37 = vld [vmem:[#allocation10 + $0x48] sm:$0xff] }
  0x42   : > { %v887_v12 = vld [vmem:[#allocation2 + $0xe] sm:$0x3]  ;;  %v538_v13 = vrot.slane %v528_v11, 7  ;;  %v564_v14 = vrot.slane %v528_v11, 6  ;;  %1050 = vmatmul.msk.f32.vlgmr.msra.gmra.mxu2 %vm518_vm0, %v528_v11  ;;  %719 = vmatpush.msrb.mxu1 %v704_v21  ;;  %v631_v35 = vld [vmem:[#allocation10 + $0x10] sm:$0xff]  ;;  %v630_v38 = vld [vmem:[#allocation10 + $0x8] sm:$0xff] }
  0x43   : > { %889 = vst.msk [vmem:[#allocation2 + $0x6] sm:$0x3] %vm888_vm1, %v887_v12  ;;  %688 = vmatpush.msrb.mxu0 %v634_v26  ;;  %664 = vmatpush.msra.mxu3 %v642_v28  ;;  %v638_v39 = vld [vmem:[#allocation10 + $0x40] sm:$0xff]  ;;  %v1169_v44 = vld [vmem:[%s1712_s2] ss:$0 sm:$0xff]  ;;  %v815_v0 = vld [vmem:[#allocation11 + $0x58] sm:$0xff]  ;;  %s908_s17 = scalar_lea.hbm %s1742_s14, %s1059_s7 }
  0x44   : > { %v539_v15 = vsel %vm536_vm2, %v537_v9, %v538_v13  ;;  %v565_v16 = vsel %vm562_vm3, %v563_v10, %v564_v14  ;;  %720 = vmatpush.msrb.mxu1 %v703_v24  ;;  %v629_v40 = vld [vmem:[#allocation10] sm:$0xff]  ;;  %v1170_v47 = vld [vmem:[%s1713_s3] ss:$0 sm:$0xff]  ;;  %v758_v7 = vld [vmem:[#allocation11 + $0x38] sm:$0xff]  ;;  %s912_s1 = sshll.u32 %s908_s17, 4  ;;  %s1346_s11 = scalar_lea.hbm %s1742_s14, 16  ;;  %s913_s1 = int_to_ptr.hbm [resolvable:$true] %s912_s1 }
  0x45   : > { %1048 = vmatmul.msk.f32.vlgmr.msra.gmra.mxu0 %vm518_vm0, %v539_v15  ;;  %1049 = vmatmul.msk.f32.vlgmr.msra.gmra.mxu1 %vm518_vm0, %v565_v16  ;;  %v627_v51 = vld [vmem:[#allocation3] sm:$0xff]  ;;  %v1171_v63 = vld [vmem:[%s1715_s5] ss:$0 sm:$0xff]  ;;  %v813_v10 = vld [vmem:[#allocation11 + $0x48] sm:$0xff]  ;;  %s1340_s4 = sshra.s32 %s913_s1, 4  ;;  %s1341_s4 = int_to_ptr.hbm [resolvable:$true] %s1340_s4 }
  0x46   : > { %721 = vmatpush.msrb.mxu1 %v702_v27  ;;  %689 = vmatpush.msrb.mxu0 %v633_v29  ;;  %v648_v52 = vrot.slane %v627_v51, 7  ;;  %v673_v53 = vrot.slane %v627_v51, 6  ;;  %v1172_v3 = vld [vmem:[%s1716_s6] ss:$0 sm:$0xff]  ;;  %v756_v11 = vld [vmem:[#allocation11 + $0x28] sm:$0xff]  ;;  %v812_v12 = vld [vmem:[#allocation11 + $0x40] sm:$0xff]  ;;  %p1347_p9 = scmp.lt.s32.totalorder %s1341_s4, %s1742_s14 }
  0x47   : > { %665 = vmatpush.msra.mxu3 %v641_v31  ;;  %v814_v8 = vld [vmem:[#allocation11 + $0x50] sm:$0xff]  ;;  %778 = vmatpush.msrb.mxu2 %v758_v7  ;;  %v755_v13 = vld [vmem:[#allocation11 + $0x20] sm:$0xff]  ;;  %v753_v14 = vld [vmem:[#allocation11 + $0x18] sm:$0xff]  ;;  %s1342_s10 = scalar_lea.hbm %s1341_s4, 8 }
  0x48   : > { %722 = vmatpush.msrb.mxu1 %v701_v30  ;;  %690 = vmatpush.msrb.mxu0 %v632_v32  ;;  %v757_v9 = vld [vmem:[#allocation11 + $0x30] sm:$0xff]  ;;  %v751_v16 = vld [vmem:[#allocation11 + $0x8] sm:$0xff]  ;;  %v750_v17 = vld [vmem:[#allocation11] sm:$0xff]  ;;  %p1343_p1 = scmp.ne.s32.totalorder %s1341_s4, %s1342_s10  ;;  %p1348_p10 = scmp.lt.s32.totalorder %s1346_s11, %s1342_s10 }
  0x49   : > { %666 = vmatpush.msra.mxu3 %v640_v34  ;;  %779 = vmatpush.msrb.mxu2 %v757_v9  ;;  %v752_v15 = vld [vmem:[#allocation11 + $0x10] sm:$0xff]  ;;  %v858_v29 = vld [vmem:[#allocation13 + $0x18] sm:$0xff]  ;;  %v856_v31 = vld [vmem:[#allocation13 + $0x8] sm:$0xff] }
  0x4a   : > { %723 = vmatpush.msrb.mxu1 %v700_v33  ;;  %691 = vmatpush.msrb.mxu0 %v631_v35  ;;  %v748_v20 = vld [vmem:[#allocation4] sm:$0xff]  ;;  %p1344_p3 = pnand %p1343_p1, %p1583_p0  ;;  %p1349_p12 = por %p1348_p10, %p1347_p9 }
  0x4b   : > { %667 = vmatpush.msra.mxu3 %v639_v37  ;;  %780 = vmatpush.msrb.mxu2 %v756_v11  ;;  %v761_v21 = vrot.slane %v748_v20, 7  ;;  %v786_v27 = vrot.slane %v748_v20, 6  ;;  %v857_v30 = vld [vmem:[#allocation13 + $0x10] sm:$0xff] }
  0x4c   : > { %724 = vmatpush.msrb.mxu1 %v699_v36  ;;  %692 = vmatpush.msrb.mxu0 %v630_v38  ;;  %v1173_v35 = vld [vmem:[%s1718_s8] ss:$0 sm:$0xff]  ;;  %p1345_p8 = pneg %p1344_p3 }
  0x4d   : > { %668 = vmatpush.msra.mxu3 %v638_v39  ;;  %781 = vmatpush.msrb.mxu2 %v755_v13  ;;  %v1174_v38 = vld [vmem:[%s1719_s9] ss:$0 sm:$0xff] }
  0x4e   : > { %693 = vmatpush.msrb.mxu0 %v629_v40  ;;  %p1350_p13 = pnand %p1349_p12, %p1345_p8 }
  0x4f   : > { %830 = vmatpush.msrb.mxu3 %v815_v0  ;;  %803 = vmatpush.msra.mxu2 %v753_v14 }
  0x50   : > { %878 = vmatpush.msra.mxu0 %v858_v29 }
  0x51   : > { %831 = vmatpush.msrb.mxu3 %v814_v8  ;;  %804 = vmatpush.msra.mxu2 %v752_v15 }
  0x52   : > { %879 = vmatpush.msra.mxu0 %v857_v30 }
  0x53   : > { %832 = vmatpush.msrb.mxu3 %v813_v10  ;;  %805 = vmatpush.msra.mxu2 %v751_v16 }
  0x54   : > { %880 = vmatpush.msra.mxu0 %v856_v31 }
  0x55   : > { %833 = vmatpush.msrb.mxu3 %v812_v12  ;;  %806 = vmatpush.msra.mxu2 %v750_v17 }
  0xc2   : > { %v559_v41 = vpop.f32.mrf.mxu0  ;;  %v585_v42 = vpop.f32.mrf.mxu1 }
  0xc3   : > { %v586_v43 = vadd.f32 %v585_v42, %v559_v41  ;;  %v855_v42 = vld [vmem:[#allocation13] sm:$0xff] }
  0xc4   : > { %881 = vmatpush.msra.mxu0 %v855_v42 }
  0xc5   : > { %v610_v45 = vpop.f32.mrf.mxu2 }
  0xc6   : > { %v613_v46 = vadd.f32 %v610_v45, %v586_v43  ;;  %v1175_v45 = vld [vmem:[%s1743_s20] ss:$0 sm:$0xff] }
  0xc8   : > { %v618_v48 = vmul.f32 %v1169_v44, %v613_v46 }
  0xca   : > { %v623_v49 = vadd.f32 %v1170_v47, %v618_v48 }
  0xcc   : > { %v624_v50 = vmax.f32 %v623_v49, 0.0 }
  0xce   : > { %626 = vst.msk [vmem:[#allocation3 + $0x8] sm:$0xff] %vm520_vm4, %v624_v50 }
  0xd5   : > { %v628_v54 = vld [vmem:[#allocation3 + $0x8] sm:$0xff] }
  0xd6   : > { %v890_v55 = vld [vmem:[#allocation3 + $0xe] sm:$0x3]  ;;  %v649_v56 = vrot.slane %v628_v54, 7  ;;  %v674_v57 = vrot.slane %v628_v54, 6  ;;  %1053 = vmatmul.msk.f32.vlgmr.msrb.gmra.mxu1 %vm520_vm4, %v628_v54 }
  0xd7   : > { %892 = vst.msk [vmem:[#allocation3 + $0x6] sm:$0x3] %vm891_vm5, %v890_v55 }
  0xd8   : > { %v650_v58 = vsel %vm536_vm2, %v648_v52, %v649_v56  ;;  %v675_v59 = vsel %vm562_vm3, %v673_v53, %v674_v57 }
  0xd9   : > { %1051 = vmatmul.msk.f32.vlgmr.msra.gmra.mxu3 %vm520_vm4, %v650_v58  ;;  %1052 = vmatmul.msk.f32.vlgmr.msrb.gmra.mxu0 %vm520_vm4, %v675_v59 }
 0x153   : > { %v726_v1 = vpop.f32.mrf.mxu1 }
 0x156   : > { %v695_v60 = vpop.f32.mrf.mxu0 }
 0x15c   : > { %v670_v61 = vpop.f32.mrf.mxu3 }
 0x15d   : > { %v696_v62 = vadd.f32 %v695_v60, %v670_v61 }
 0x15f   : > { %v729_v2 = vadd.f32 %v726_v1, %v696_v62 }
 0x161   : > { %v734_v4 = vmul.f32 %v1171_v63, %v729_v2 }
 0x163   : > { %v739_v5 = vadd.f32 %v1172_v3, %v734_v4 }
 0x165   : > { %v740_v6 = vmax.f32 %v739_v5, 0.0 }
 0x167   : > { %742 = vrot.lane.b32.xlu0 %v740_v6, %s1425_s19 }
 0x1d9   : > { %v743_v18 = vpop.permute.xlu0 %742 }
 0x1da   : > { %v745_v19 = vmax.f32 %v740_v6, %v743_v18 }
 0x1dc   : > { %747 = vst.msk [vmem:[#allocation4 + $0x8] sm:$0xff] %vm522_vm6, %v745_v19 }
 0x1e3   : > { %v749_v22 = vld [vmem:[#allocation4 + $0x8] sm:$0xff] }
 0x1e4   : > { %v893_v23 = vld [vmem:[#allocation4 + $0xe] sm:$0x3]  ;;  %v762_v24 = vrot.slane %v749_v22, 7  ;;  %1056 = vmatmul.msk.f32.vlgmr.msrb.gmra.mxu3 %vm522_vm6, %v749_v22  ;;  %v787_v26 = vrot.slane %v749_v22, 6 }
 0x1e5   : > { %895 = vst.msk [vmem:[#allocation4 + $0x6] sm:$0x3] %vm894_vm7, %v893_v23 }
 0x1e6   : > { %v763_v25 = vsel %vm536_vm2, %v761_v21, %v762_v24  ;;  %v788_v28 = vsel %vm562_vm3, %v786_v27, %v787_v26 }
 0x1e7   : > { %1054 = vmatmul.msk.f32.vlgmr.msrb.gmra.mxu2 %vm522_vm6, %v763_v25 }
 0x1ef   : > { %1055 = vmatmul.msk.f32.vlgmr.msra.gmra.mxu2 %vm522_vm6, %v788_v28 }
 0x267   : > { %v835_v36 = vpop.f32.mrf.mxu3 }
 0x26a   : > { %v783_v32 = vpop.f32.mrf.mxu2 }
 0x272   : > { %v808_v33 = vpop.f32.mrf.mxu2 }
 0x273   : > { %v809_v34 = vadd.f32 %v808_v33, %v783_v32 }
 0x275   : > { %v838_v37 = vadd.f32 %v835_v36, %v809_v34 }
 0x277   : > { %v843_v39 = vmul.f32 %v1173_v35, %v838_v37 }
 0x279   : > { %v848_v40 = vadd.f32 %v1174_v38, %v843_v39 }
 0x27b   : > { %v849_v41 = vmax.f32 %v848_v40, 0.0 }
 0x27d   : > { %851 = vrot.lane.b32.xlu0 %v849_v41, %s1425_s19  ;;  %s910_s19 = sshll.u32 %s513_s15, 4  ;;  %s911_s19 = int_to_ptr.vmem [resolvable:$true] %s910_s19 }
 0x2ef   : > { %v852_v43 = vpop.permute.xlu0 %851 }
 0x2f0   : > { %v854_v44 = vmax.f32 %v849_v41, %v852_v43 }
 0x2f2   : > { %1057 = vmatmul.msk.f32.vlgmr.msra.gmra.mxu0 %vm522_vm6, %v854_v44 }
 0x36f   : > { %v883_v46 = vpop.f32.mrf.mxu0 }
 0x370   : > { %v884_v47 = vadd.f32 %v1175_v45, %v883_v46 }
 0x372   : > { %886 = vst.msk [vmem:[%s513_s15] sm:$0xff] %vm520_vm4, %v884_v47 }
 0x373   : > { %1353 = shalt.err (!%p1350_p13)
}
 0x374   : > { %1080 = dma.vmem_to_hbm [thread:$0]  (%p1583_p0), %s911_s19, 128, %s913_s1, %s897_s24  }
 0x375 PF: > { %s924_s18 = sand.u32 1, %s1396_s21   ;;  %p1100_p2 = pnand %p1038_p6, %p1590_p5 }
 0x376   : > { %s925_s12 = scalar_lea.sflag [#allocation7], %s924_s18 }
 0x377   : > { %p1101_p4 = pneg %p1100_p2 }
 0x379   : > { %1391 = dma.done.wait (%p1101_p4), %s925_s12, 128  }
 0x37a   : > { %1393 = vsyncadd (%p1101_p4), %s925_s12, 4294967168  ;;  %s30_s26 = sadd.s32 1, %s1416_s26   ;;  %s1744_s21 = smov %s1400_s22 }
 0x37b   : > { %p27_p7 = scmp.ge.s32.totalorder %s30_s26, 4   ;;  %s1745_s22 = smov %s1404_s23 }
 0x37c   : > { %s1746_s23 = smov %s1588_s30  ;;  %s1747_s24 = smov %s1412_s25 }
 0x37d   : > { %s1748_s25 = smov %s1750_s27  ;;  %29 = sbr.rel (!%p27_p7) target bundleno = 15 (0xf), region = 139 }
 0x382   :  { %931 = vsyncpa [#allocation6], 1 }
 0x383   :  { %933 = vsyncpa [#allocation6 + $0x1], 1 }
 0x384   :  { %934 = vsyncpa [#allocation9], 1 }
 0x385   :  { %935 = vsyncpa [#allocation12], 1 }
 0x386   :  { %936 = vsyncpa [#allocation7], 1 }
 0x387   :  { %938 = vsyncpa [#allocation7 + $0x1], 1 }

</bundles_post_ra>
